<compile_context>
chip_gen: v7x
topology: tpu7x:2x2x1
jax: 0.10.0
libtpu: 0.0.40
codegen_flags: <defaults>
</compile_context>

<pallas_src>
import jax
import jax.numpy as jnp
from jax.experimental import pallas as pl
from jax.experimental.pallas import tpu as pltpu


def _singular_kernel(x_ref, w_ref, o_ref):
    # w_ref: (1, W) lane-folded weights; x_ref/o_ref: (row_tile, W) tiles.
    w = w_ref[...].astype(jnp.float32)
    scale = jnp.exp(-(w * w))                       # EUP; cheap per step
    o_ref[...] = (x_ref[...].astype(jnp.float32) * scale).astype(o_ref.dtype)


def _choose_fold(B, d, itemsize, max_width=4096):
    """Pick k (dividing B) so the folded lane width k*d is a multiple of 128."""
    if d % 128 == 0:
        return 1
    best = None
    for k in range(1, B + 1):
        if B % k == 0 and (k * d) % 128 == 0 and k * d <= max_width:
            best = k  # keep the largest lane-dense fold within the width budget
    if best is not None:
        return best
    # No lane-dense fold available: if the whole array is tiny, run it as a
    # single full-extent block (legal regardless of divisibility); otherwise
    # leave it unfolded (full-d blocks are legal, just with masked stores).
    if B * d * itemsize <= (1 << 22):
        return B
    return 1


def singular_layer(x, weights, *, target_block_bytes=4 * 1024 * 1024):
    """x: (..., d), weights: (d,) -> x * exp(-weights**2), same shape/dtype as x."""
    orig_shape = x.shape
    d = orig_shape[-1]
    assert weights.shape == (d,), "weights must have shape (d,)"

    x2 = x.reshape(-1, d)
    B = x2.shape[0]
    itemsize = jnp.dtype(x.dtype).itemsize

    # ---- lane folding: (B, d) -> (Bf, W) with W a multiple of 128 (or full extent)
    k = _choose_fold(B, d, itemsize)
    W = k * d
    Bf = B // k
    x_f = x2.reshape(Bf, W)
    w_f = jnp.tile(weights, k).reshape(1, W)   # row-major tile matches the fold

    # ---- row tiling: ~target_block_bytes per block, sublane-aligned
    sub = {4: 8, 2: 16, 1: 32}.get(itemsize, 8)     # (8,128) f32 / (16,128) bf16 tiles
    bytes_per_row = W * itemsize
    rows = max(1, target_block_bytes // bytes_per_row)
    if rows >= Bf:
        row_tile = Bf                               # single block over all rows
    else:
        row_tile = max(sub, (rows // sub) * sub)    # multiple of the sublane tile
    grid = (pl.cdiv(Bf, row_tile),)

    out_f = pl.pallas_call(
        _singular_kernel,
        out_shape=jax.ShapeDtypeStruct((Bf, W), x.dtype),
        grid_spec=pltpu.PrefetchScalarGridSpec(
            num_scalar_prefetch=0,
            grid=grid,
            in_specs=[
                pl.BlockSpec((row_tile, W), lambda i: (i, 0)),   # x tile
                pl.BlockSpec((1, W), lambda i: (0, 0)),          # weights (resident)
            ],
            out_specs=pl.BlockSpec((row_tile, W), lambda i: (i, 0)),
        ),
        compiler_params=pltpu.CompilerParams(
            dimension_semantics=("parallel",),            # v7x: shard rows across 2 TCs
            vmem_limit_bytes=40 * 1024 * 1024,            # room for 4x ~4 MiB buffers,
        ),                                                # well under v7x's 64 MiB
    )(x_f, w_f)

    return out_f.reshape(orig_shape)


if __name__ == "__main__":
    # Small shapes consistent with the module: x of shape (batch, d).
    batch, d = 16, 32

    key = jax.random.PRNGKey(0)
    kx, kw = jax.random.split(key)

    x = jax.random.normal(kx, (batch, d), dtype=jnp.float32)
    # Deterministic init matching torch.normal(mean=0.0, std=2.0/d, size=(d,))
    weights = (2.0 / d) * jax.random.normal(kw, (d,), dtype=jnp.float32)

    out = jax.block_until_ready(singular_layer(x, weights))

    # Reference check in plain JAX
    ref = x * jnp.exp(-(weights ** 2))
    assert out.shape == x.shape
    assert jnp.allclose(out, ref, atol=1e-6, rtol=1e-6), "mismatch vs reference"

    print("KERNEL_OK")
</pallas_src>

<mosaic_0001>
module attributes {stable_mosaic.version = 11 : i64} {
  func.func @_singular_kernel(%arg0: i32, %arg1: memref<1x512xf32, #tpu.memory_space<vmem>>, %arg2: memref<1x512xf32, #tpu.memory_space<vmem>>, %arg3: memref<1x512xf32, #tpu.memory_space<vmem>>) attributes {dimension_semantics = [#tpu.dimension_semantics<parallel>], iteration_bounds = array<i64: 1>, scalar_prefetch = 0 : i64, scratch_operands = 0 : i64, tpu.core_type = #tpu.core_type<tc>, window_params = [{transform_indices = @transform_0, window_bounds = array<i64: 1, 512>}, {pipeline_mode = #tpu.pipeline_mode<synchronous>, transform_indices = @transform_1, window_bounds = array<i64: 1, 512>}, {transform_indices = @transform_2, window_bounds = array<i64: 1, 512>}]} {
    %c0 = arith.constant 0 : index
    %c0_0 = arith.constant 0 : index
    %0 = vector.load %arg2[%c0, %c0_0] : memref<1x512xf32, #tpu.memory_space<vmem>>, vector<1x512xf32>
    %1 = arith.mulf %0, %0 : vector<1x512xf32>
    %cst = arith.constant 0.000000e+00 : f32
    %2 = vector.broadcast %cst : f32 to vector<1x512xf32>
    %3 = arith.subf %2, %1 : vector<1x512xf32>
    %4 = math.exp %3 : vector<1x512xf32>
    %c0_1 = arith.constant 0 : index
    %c0_2 = arith.constant 0 : index
    %5 = vector.load %arg1[%c0_1, %c0_2] : memref<1x512xf32, #tpu.memory_space<vmem>>, vector<1x512xf32>
    %6 = arith.mulf %5, %4 : vector<1x512xf32>
    %c0_3 = arith.constant 0 : index
    %c0_4 = arith.constant 0 : index
    %7 = vector.load %arg3[%c0_3, %c0_4] : memref<1x512xf32, #tpu.memory_space<vmem>>, vector<1x512xf32>
    tpu.vector_store %arg3[%c0_3, %c0_4], %6 {strides = array<i32>} : memref<1x512xf32, #tpu.memory_space<vmem>>, vector<1x512xf32>,
    return
  }
  func.func @transform_0(%arg0: i32) -> (i32, i32) {
    %c0_i32 = arith.constant 0 : i32
    %c0_i32_0 = arith.constant 0 : i32
    return %arg0, %c0_i32 : i32, i32
  }
  func.func @transform_1(%arg0: i32) -> (i32, i32) {
    %c0_i32 = arith.constant 0 : i32
    %c0_i32_0 = arith.constant 0 : i32
    %c0_i32_1 = arith.constant 0 : i32
    return %c0_i32, %c0_i32_0 : i32, i32
  }
  func.func @transform_2(%arg0: i32) -> (i32, i32) {
    %c0_i32 = arith.constant 0 : i32
    %c0_i32_0 = arith.constant 0 : i32
    return %arg0, %c0_i32 : i32, i32
  }
}

</mosaic_0001>

<bundles_post_ra>
// kernel: tpu_custom_call.1
= control target key start
LH: loop header
LB: loop body
LE: loop exit
PB: predicated region body
PF: predicated region fallthrough
CT: control target
= control target key end

     0   :  { %7 = vsyncpa [#allocation3], 0  ;;  %s195_s0 = inlined_call_operand.hbm [shape: f32[1,512], index: 0, kind: input, shape index: {}]   ;;  %s196_s1 = inlined_call_operand.hbm [shape: f32[1,512], index: 1, kind: input, shape index: {}]   ;;  %s197_s2 = inlined_call_operand.hbm [shape: f32[1,512], index: 2, kind: output, shape index: {}]  }
   0x1   :  { %8 = vsyncpa [#allocation6], 0 }
   0x2   :  { %9 = vsyncpa [#allocation4], 0  ;;  %s141_s9 = smov [#allocation2]   ;;  %s142_s11 = smov [#allocation5]  }
   0x3   :  { %s16_s10 = sshll.u32 %s141_s9, 4  ;;  %s26_s12 = sshll.u32 %s142_s11, 4  ;;  %s17_s10 = int_to_ptr.vmem [resolvable:$true] %s16_s10  ;;  %s27_s12 = int_to_ptr.vmem [resolvable:$true] %s26_s12 }
   0x4   :  { %s69_s15 = scalar_lea.hbm %s195_s0, 64 }
   0x5   :  { %p70_p0 = scmp.ne.s32.totalorder %s195_s0, %s69_s15  ;;  %p73_p1 = scmp.lt.u32.totalorder %s69_s15, %s195_s0 }
   0x7   :  { %p75_p2 = pnand %p73_p1, %p70_p0 }
   0x9   :  { %78 = shalt.err (!%p75_p2)
}
   0xa   :  { %s79_s20 = scalar_lea.vmem %s17_s10, 64  ;;  %p84_p4 = scmp.lt.s32.totalorder %s17_s10, %s17_s10 }
   0xb   :  { %p80_p3 = scmp.ne.s32.totalorder %s17_s10, %s79_s20  ;;  %p85_p5 = scmp.lt.s32.totalorder %s79_s20, %s79_s20 }
   0xd   :  { %p86_p6 = por %p85_p5, %p84_p4 }
   0xf   :  { %p87_p7 = pnand %p86_p6, %p80_p3 }
  0x11   :  { %90 = shalt.err (!%p87_p7)
}
  0x12   :  { %19 = dma.hbm_to_vmem [thread:$0]  %s195_s0, 64, %s17_s10, [#allocation3]  }
  0x13   :  { %s91_s25 = scalar_lea.hbm %s196_s1, 64 }
  0x14   :  { %p92_p8 = scmp.ne.s32.totalorder %s196_s1, %s91_s25  ;;  %p95_p9 = scmp.lt.u32.totalorder %s91_s25, %s196_s1 }
  0x16   :  { %p97_p10 = pnand %p95_p9, %p92_p8 }
  0x18   :  { %100 = shalt.err (!%p97_p10)
}
  0x19   :  { %s101_s30 = scalar_lea.vmem %s27_s12, 64  ;;  %p106_p12 = scmp.lt.s32.totalorder %s27_s12, %s27_s12 }
  0x1a   :  { %p102_p11 = scmp.ne.s32.totalorder %s27_s12, %s101_s30  ;;  %p107_p13 = scmp.lt.s32.totalorder %s101_s30, %s101_s30 }
  0x1c   :  { %p108_p0 = por %p107_p13, %p106_p12 }
  0x1e   :  { %p109_p1 = pnand %p108_p0, %p102_p11 }
  0x20   :  { %112 = shalt.err (!%p109_p1)
}
  0x21   :  { %29 = dma.hbm_to_vmem [thread:$0]  %s196_s1, 64, %s27_s12, [#allocation6]  }
  0x22   :  { %135 = dma.done.wait [#allocation3], 64  }
  0x23   :  { %136 = vsyncadd [#allocation3], 4294967232 }
  0x24   :  { %137 = dma.done.wait [#allocation6], 64  }
  0x25   :  { %138 = vsyncadd [#allocation6], 4294967232  ;;  %v36_v0 = vld [vmem:[#allocation5] sm:$0xf]  ;;  %v43_v4 = vlaneseq  ;;  %v41_v5 = vld [vmem:[#allocation2] sm:$0xf] }
  0x26   :  { %v37_v1 = vmul.f32 %v36_v0, %v36_v0  ;;  %s143_s4 = smov [#allocation7]  }
  0x27   :  { %s54_s5 = sshll.u32 %s143_s4, 4  ;;  %vm45_vm0 = vcmp.lt.s32.totalorder %v43_v4, 512  ;;  %s55_s5 = int_to_ptr.vmem [resolvable:$true] %s54_s5 }
  0x28   :  { %v38_v2 = vsub.f32 0.0, %v37_v1  ;;  %s113_s6 = scalar_lea.vmem %s55_s5, 64  ;;  %p118_p3 = scmp.lt.s32.totalorder %s55_s5, %s55_s5 }
  0x29   :  { %p114_p2 = scmp.ne.s32.totalorder %s55_s5, %s113_s6  ;;  %p119_p4 = scmp.lt.s32.totalorder %s113_s6, %s113_s6 }
  0x2a   :  { %v39_v3 = vmul.f32 1.442695, %v38_v2 }
  0x2b   :  { %p120_p5 = por %p119_p4, %p118_p3 }
  0x2c   :  { %67 = vpow2.f32 %v39_v3 }
  0x2d   :  { %p121_p6 = pnand %p120_p5, %p114_p2 }
  0x36   :  { %v68_v6 = vpop.eup %67 }
  0x37   :  { %v42_v7 = vmul.f32 %v68_v6, %v41_v5 }
  0x39   :  { %47 = vst.msk [vmem:[#allocation7] sm:$0xf] %vm45_vm0, %v42_v7 }
  0x3a   :  { %124 = shalt.err (!%p121_p6)
}
  0x3b   :  { %s125_s8 = scalar_lea.hbm %s197_s2, 64 }
  0x3c   :  { %p126_p7 = scmp.ne.s32.totalorder %s197_s2, %s125_s8  ;;  %p129_p8 = scmp.lt.u32.totalorder %s125_s8, %s197_s2 }
  0x3e   :  { %p131_p9 = pnand %p129_p8, %p126_p7 }
  0x40   :  { %134 = shalt.err (!%p131_p9)
}
  0x41   :  { %57 = dma.vmem_to_hbm [thread:$0]  %s55_s5, 64, %s197_s2, [#allocation4]  }
  0x42   :  { %139 = dma.done.wait [#allocation4], 64  }
  0x43   :  { %140 = vsyncadd [#allocation4], 4294967232 }
  0x44   :  { %61 = vsyncpa [#allocation3], 1 }
  0x45   :  { %62 = vsyncpa [#allocation6], 1 }
  0x46   :  { %63 = vsyncpa [#allocation4], 1 }

</bundles_post_ra>
